<compile_context>
chip_gen: v5e
topology: v5e:2x2
jax: 0.10.0
libtpu: 0.0.40
codegen_flags: <defaults>
</compile_context>

<pallas_src>
import jax
import jax.numpy as jnp
from jax.experimental import pallas as pl
from jax.experimental.pallas import tpu as pltpu


def _make_kernel(n_proj, dim):
    """Kernel over one (TB, N*D) value tile; N (= n_proj) and D are static."""

    def kernel(v_ref, wbd_ref, o_ref):
        # v_ref:   (TB, N*D) value rows (lane-dense)
        # wbd_ref: (N*D, N)  block-diagonal Linear weight
        # o_ref:   (TB, D)   output rows

        # ---- Pass 1: all N scores per row in one MXU dot -> (TB, N). ----
        scores = jnp.dot(
            v_ref[...], wbd_ref[...],
            preferred_element_type=jnp.float32,
            precision=jax.lax.Precision.HIGHEST,
        )

        # Softmax over N (bias dropped: a scalar shared over N cancels here).
        m = jnp.max(scores, axis=-1, keepdims=True)            # (TB, 1)
        e = jnp.exp(scores - m)                                 # (TB, N)
        denom = jnp.sum(e, axis=-1, keepdims=True)              # (TB, 1)
        inv = pl.reciprocal(denom, approx=False)                # exact

        # ---- Pass 2: weighted sum over N, re-reading chunks from VMEM. ----
        # Chunks are re-read (VMEM loads are cheap) instead of being kept
        # live across the softmax, so the vreg file never spills; each chunk
        # is cast to f32 exactly once and normalization is deferred to a
        # single multiply at the end.
        acc = e[:, 0:1] * v_ref[:, 0:dim].astype(jnp.float32)
        for n in range(1, n_proj):
            acc = acc + e[:, n:n + 1] * v_ref[:, n * dim:(n + 1) * dim].astype(jnp.float32)

        o_ref[...] = (acc * inv).astype(o_ref.dtype)

    return kernel


def _tpu_params():
    """Best-effort query of VMEM capacity and TensorCore count."""
    vmem_bytes = 64 << 20     # conservative default (covers v7x's 64 MiB)
    num_cores = 1             # conservative default (single-TC behaviour)
    try:
        info = pltpu.get_tpu_info()
        vmem_bytes = int(getattr(info, "vmem_capacity_bytes", vmem_bytes))
        for attr in ("num_cores", "core_count", "tensor_core_count",
                     "num_tensorcores"):
            v = getattr(info, attr, None)
            if v:
                num_cores = int(v)
                break
    except Exception:
        pass
    return vmem_bytes, num_cores


def _choose_tb(B, N, D, itemsize, num_cores):
    """Batch rows per grid step.

    HBM-bound: target ~4 MiB of value data per step (capped by bytes, not
    rows) so the fixed per-step overhead is amortized.  Align TB to the
    dtype's sublane packing.  Only on multi-TensorCore parts (v7x) shrink so
    every core gets at least two grid steps; single-TC chips (v5e/v6e) keep
    the largest tile.
    """
    row_bytes = max(N * D * itemsize, 1)
    sublane = max(8, 32 // max(itemsize, 1))        # 8 f32 / 16 bf16 / 32 i8
    tb = max(sublane, (4 << 20) // row_bytes)       # ~4 MiB of value per tile
    if tb >= B:
        return B
    if num_cores > 1:
        while tb > sublane and pl.cdiv(B, tb) < 2 * num_cores:
            tb //= 2
    return max(sublane, (tb // sublane) * sublane)


def proj_attention_forward(value, weight, bias=None):
    """value: [B, N, D]; weight: [1, D] (torch nn.Linear layout); bias: [1].

    The scalar bias is shared across the softmax axis (dim=1), so
    softmax(s + b) == softmax(s); it is therefore not passed to the kernel
    (exact, not an approximation).
    """
    del bias
    B, N, D = value.shape
    itemsize = value.dtype.itemsize

    v2 = value.reshape(B, N * D)                 # contiguous, lane-dense rows
    # Block-diagonal (N*D, N) weight: column n holds `weight` in rows
    # [n*D, (n+1)*D), so one MXU dot yields all N scores per batch row.
    w_col = weight.reshape(D, 1).astype(jnp.float32)
    w_bd = jnp.kron(jnp.eye(N, dtype=jnp.float32), w_col).astype(value.dtype)

    vmem_phys, num_cores = _tpu_params()
    TB = _choose_tb(B, N, D, itemsize, num_cores)
    grid = (pl.cdiv(B, TB),)

    # VMEM budget: double-buffered input/output tiles + weight + slack,
    # clamped per generation (<=48 MiB on 64-MiB parts, <=64 MiB otherwise).
    need = (2 * TB * N * D * itemsize + 2 * TB * D * itemsize
            + 2 * w_bd.size * w_bd.dtype.itemsize + (4 << 20))
    cap = (48 << 20) if vmem_phys <= (64 << 20) else (64 << 20)
    vmem_limit = int(min(max(need, 16 << 20), cap))

    out2 = pl.pallas_call(
        _make_kernel(N, D),
        out_shape=jax.ShapeDtypeStruct((B, D), value.dtype),
        grid_spec=pltpu.PrefetchScalarGridSpec(
            num_scalar_prefetch=0,
            grid=grid,
            in_specs=[
                pl.BlockSpec((TB, N * D), lambda i: (i, 0)),  # value rows
                pl.BlockSpec((N * D, N), lambda i: (0, 0)),   # block-diag weight
            ],
            # NOTE: for D < 128 this is a masked partial store; packing
            # 128//D batch rows per output row is a further (unimplemented,
            # measure-both) optimization.
            out_specs=pl.BlockSpec((TB, D), lambda i: (i, 0)),
        ),
        compiler_params=pltpu.CompilerParams(
            dimension_semantics=("parallel",),
            vmem_limit_bytes=vmem_limit,
        ),
    )(v2, w_bd)
    return out2.reshape(B, 1, D)


def _reference(value, weight, bias):
    # plain-JAX reference mirroring the torch module
    scores = jnp.einsum("bnd,od->bno", value, weight) + bias      # (B, N, 1)
    p = jax.nn.softmax(scores, axis=1)                            # (B, N, 1)
    return jnp.einsum("bno,bnd->bod", p, value)                   # (B, 1, D)


if __name__ == "__main__":
    B, N, D = 2, 4, 32   # batch, number of dict entries, feature dim

    key = jax.random.PRNGKey(0)
    k_vals, k_w, k_b = jax.random.split(key, 3)

    # build the "value_dict": N tensors each of shape [B, D]
    vkeys = jax.random.split(k_vals, N)
    value_dict = {f"v{i}": jax.random.normal(vkeys[i], (B, D), jnp.float32)
                  for i in range(N)}
    # torch.stack(..., dim=1) -> [B, N, D]
    value = jnp.stack([v for v in value_dict.values()], axis=1)

    # nn.Linear(D, 1) init: U(-1/sqrt(D), 1/sqrt(D))
    bound = 1.0 / (D ** 0.5)
    weight = jax.random.uniform(k_w, (1, D), jnp.float32, -bound, bound)
    bias = jax.random.uniform(k_b, (1,), jnp.float32, -bound, bound)

    out = proj_attention_forward(value, weight, bias)
    out = jax.block_until_ready(out)

    ref = _reference(value, weight, bias)
    assert out.shape == (B, 1, D), out.shape
    # Kernel math is f32 with an exact reciprocal and HIGHEST-precision score
    # dot; a small margin is kept for MXU pass-precision differences across
    # TPU generations.
    max_err = float(jnp.max(jnp.abs(out - ref)))
    assert jnp.allclose(out, ref, atol=2e-3, rtol=2e-3), f"max err {max_err}"

    print("KERNEL_OK")
</pallas_src>

<mosaic_0001>
module attributes {stable_mosaic.version = 11 : i64} {
  func.func @kernel(%arg0: i32, %arg1: memref<2x128xf32, #tpu.memory_space<vmem>>, %arg2: memref<128x4xf32, #tpu.memory_space<vmem>>, %arg3: memref<2x32xf32, #tpu.memory_space<vmem>>) attributes {dimension_semantics = [#tpu.dimension_semantics<parallel>], iteration_bounds = array<i64: 1>, scalar_prefetch = 0 : i64, scratch_operands = 0 : i64, tpu.core_type = #tpu.core_type<tc>, window_params = [{transform_indices = @transform_0, window_bounds = array<i64: 2, 128>}, {pipeline_mode = #tpu.pipeline_mode<synchronous>, transform_indices = @transform_1, window_bounds = array<i64: 128, 4>}, {transform_indices = @transform_2, window_bounds = array<i64: 2, 32>}]} {
    %c0 = arith.constant 0 : index
    %c0_0 = arith.constant 0 : index
    %0 = vector.load %arg1[%c0, %c0_0] : memref<2x128xf32, #tpu.memory_space<vmem>>, vector<2x128xf32>
    %c0_1 = arith.constant 0 : index
    %c0_2 = arith.constant 0 : index
    %1 = vector.load %arg2[%c0_1, %c0_2] : memref<128x4xf32, #tpu.memory_space<vmem>>, vector<128x4xf32>
    %cst = arith.constant dense<0.000000e+00> : vector<2x4xf32>
    %2 = tpu.matmul %0, %1, %cst {dimension_numbers = #tpu.dot_dimension_numbers<[1], [0], [0], [1], [0, 0, 1, 1], [], []>, precision = #tpu.contract_precision<fp32>} : vector<2x128xf32>, vector<128x4xf32>, vector<2x4xf32> -> vector<2x4xf32>
    %cst_3 = arith.constant dense<0xFF800000> : vector<2xf32>
    %3 = vector.multi_reduction <maximumf>, %2, %cst_3 [1] : vector<2x4xf32> to vector<2xf32>
    %4 = vector.shape_cast %3 : vector<2xf32> to vector<2x1xf32>
    %5 = vector.broadcast %4 : vector<2x1xf32> to vector<2x4xf32>
    %6 = arith.subf %2, %5 : vector<2x4xf32>
    %7 = math.exp %6 : vector<2x4xf32>
    %cst_4 = arith.constant dense<0.000000e+00> : vector<2xf32>
    %8 = vector.multi_reduction <add>, %7, %cst_4 [1] : vector<2x4xf32> to vector<2xf32>
    %9 = vector.shape_cast %8 : vector<2xf32> to vector<2x1xf32>
    %10 = tpu.reciprocal %9 : vector<2x1xf32> -> vector<2x1xf32>
    %11 = vector.extract_strided_slice %7 {offsets = [0, 0], sizes = [2, 1], strides = [1, 1]} : vector<2x4xf32> to vector<2x1xf32>
    %c0_5 = arith.constant 0 : index
    %c0_6 = arith.constant 0 : index
    %12 = vector.load %arg1[%c0_5, %c0_6] : memref<2x128xf32, #tpu.memory_space<vmem>>, vector<2x32xf32>
    %13 = vector.broadcast %11 : vector<2x1xf32> to vector<2x32xf32>
    %14 = arith.mulf %13, %12 : vector<2x32xf32>
    %15 = vector.extract_strided_slice %7 {offsets = [0, 1], sizes = [2, 1], strides = [1, 1]} : vector<2x4xf32> to vector<2x1xf32>
    %c0_7 = arith.constant 0 : index
    %c32 = arith.constant 32 : index
    %16 = vector.load %arg1[%c0_7, %c32] : memref<2x128xf32, #tpu.memory_space<vmem>>, vector<2x32xf32>
    %17 = vector.broadcast %15 : vector<2x1xf32> to vector<2x32xf32>
    %18 = arith.mulf %17, %16 : vector<2x32xf32>
    %19 = arith.addf %14, %18 : vector<2x32xf32>
    %20 = vector.extract_strided_slice %7 {offsets = [0, 2], sizes = [2, 1], strides = [1, 1]} : vector<2x4xf32> to vector<2x1xf32>
    %c0_8 = arith.constant 0 : index
    %c64 = arith.constant 64 : index
    %21 = vector.load %arg1[%c0_8, %c64] : memref<2x128xf32, #tpu.memory_space<vmem>>, vector<2x32xf32>
    %22 = vector.broadcast %20 : vector<2x1xf32> to vector<2x32xf32>
    %23 = arith.mulf %22, %21 : vector<2x32xf32>
    %24 = arith.addf %19, %23 : vector<2x32xf32>
    %25 = vector.extract_strided_slice %7 {offsets = [0, 3], sizes = [2, 1], strides = [1, 1]} : vector<2x4xf32> to vector<2x1xf32>
    %c0_9 = arith.constant 0 : index
    %c96 = arith.constant 96 : index
    %26 = vector.load %arg1[%c0_9, %c96] : memref<2x128xf32, #tpu.memory_space<vmem>>, vector<2x32xf32>
    %27 = vector.broadcast %25 : vector<2x1xf32> to vector<2x32xf32>
    %28 = arith.mulf %27, %26 : vector<2x32xf32>
    %29 = arith.addf %24, %28 : vector<2x32xf32>
    %30 = vector.broadcast %10 : vector<2x1xf32> to vector<2x32xf32>
    %31 = arith.mulf %29, %30 : vector<2x32xf32>
    %c0_10 = arith.constant 0 : index
    %c0_11 = arith.constant 0 : index
    %32 = vector.load %arg3[%c0_10, %c0_11] : memref<2x32xf32, #tpu.memory_space<vmem>>, vector<2x32xf32>
    tpu.vector_store %arg3[%c0_10, %c0_11], %31 {strides = array<i32>} : memref<2x32xf32, #tpu.memory_space<vmem>>, vector<2x32xf32>,
    return
  }
  func.func @transform_0(%arg0: i32) -> (i32, i32) {
    %c0_i32 = arith.constant 0 : i32
    %c0_i32_0 = arith.constant 0 : i32
    return %arg0, %c0_i32 : i32, i32
  }
  func.func @transform_1(%arg0: i32) -> (i32, i32) {
    %c0_i32 = arith.constant 0 : i32
    %c0_i32_0 = arith.constant 0 : i32
    %c0_i32_1 = arith.constant 0 : i32
    return %c0_i32, %c0_i32_0 : i32, i32
  }
  func.func @transform_2(%arg0: i32) -> (i32, i32) {
    %c0_i32 = arith.constant 0 : i32
    %c0_i32_0 = arith.constant 0 : i32
    return %arg0, %c0_i32 : i32, i32
  }
}

</mosaic_0001>

<bundles_post_ra>
// kernel: tpu_custom_call.1
= control target key start
LH: loop header
LB: loop body
LE: loop exit
PB: predicated region body
PF: predicated region fallthrough
CT: control target
= control target key end

     0   :  { %s817_s0 = inlined_call_operand.vmem [shape: f32[2,128], index: 0, kind: input, shape index: {}]   ;;  %s818_s1 = inlined_call_operand.vmem [shape: f32[128,4], index: 1, kind: input, shape index: {}]   ;;  %s819_s2 = inlined_call_operand.hbm [shape: f32[2,32], index: 2, kind: output, shape index: {}]  }
   0x1   :  { %v28_v0 = vld [vmem:[%s818_s1 + $0x78] sm:$0xff]  ;;  %v27_v1 = vld [vmem:[%s818_s1 + $0x70] sm:$0xff]  ;;  %v26_v2 = vld [vmem:[%s818_s1 + $0x68] sm:$0xff] }
   0x2   :  { %v524_v3 = vand.u32 4294901760, %v28_v0  ;;  %v526_v4 = vand.u32 4294901760, %v27_v1  ;;  %v528_v5 = vand.u32 4294901760, %v26_v2  ;;  %v25_v6 = vld [vmem:[%s818_s1 + $0x60] sm:$0xff]  ;;  %v24_v7 = vld [vmem:[%s818_s1 + $0x58] sm:$0xff]  ;;  %v23_v8 = vld [vmem:[%s818_s1 + $0x50] sm:$0xff] }
   0x3   :  { %v539_v9 = vand.u32 4294901760, %v25_v6  ;;  %v541_v10 = vand.u32 4294901760, %v24_v7  ;;  %v543_v11 = vand.u32 4294901760, %v23_v8  ;;  %v22_v12 = vld [vmem:[%s818_s1 + $0x48] sm:$0xff]  ;;  %v21_v13 = vld [vmem:[%s818_s1 + $0x40] sm:$0xff]  ;;  %v20_v18 = vld [vmem:[%s818_s1 + $0x38] sm:$0xff] }
   0x4   :  { %30 = vmatpush.msra.mxu0 %v524_v3  ;;  %v553_v14 = vsub.f32 %v28_v0, %v524_v3  ;;  %v556_v15 = vsub.f32 %v27_v1, %v526_v4  ;;  %v559_v16 = vsub.f32 %v26_v2, %v528_v5  ;;  %v561_v17 = vand.u32 4294901760, %v22_v12  ;;  %226 = vmatpush.msra.mxu3 %v524_v3  ;;  %v19_v26 = vld [vmem:[%s818_s1 + $0x30] sm:$0xff] }
   0x5   :  { %v568_v19 = vsub.f32 %v25_v6, %v539_v9  ;;  %v571_v20 = vsub.f32 %v24_v7, %v541_v10  ;;  %v574_v21 = vsub.f32 %v23_v8, %v543_v11  ;;  %v580_v25 = vand.u32 4294901760, %v21_v13 }
   0x6   :  { %32 = vmatpush.msra.mxu0 %v526_v4  ;;  %v72_v22 = vand.u32 4294901760, %v553_v14  ;;  %v78_v23 = vand.u32 4294901760, %v556_v15  ;;  %v84_v24 = vand.u32 4294901760, %v559_v16  ;;  %173 = vmatpush.msra.mxu2 %v553_v14  ;;  %v587_v28 = vand.u32 4294901760, %v20_v18 }
   0x7   :  { %v90_v27 = vand.u32 4294901760, %v568_v19  ;;  %v590_v29 = vsub.f32 %v22_v12, %v561_v17  ;;  %228 = vmatpush.msra.mxu3 %v526_v4 }
   0x8   :  { %7 = vsyncpa [#allocation3], 0  ;;  %34 = vmatpush.msra.mxu0 %v528_v5  ;;  %v73_v30 = vsub.f32 %v553_v14, %v72_v22  ;;  %v79_v31 = vsub.f32 %v556_v15, %v78_v23  ;;  %v85_v32 = vsub.f32 %v559_v16, %v84_v24  ;;  %v96_v33 = vand.u32 4294901760, %v571_v20  ;;  %176 = vmatpush.msra.mxu2 %v556_v15  ;;  %v18_v36 = vld [vmem:[%s818_s1 + $0x28] sm:$0xff]  ;;  %v17_v42 = vld [vmem:[%s818_s1 + $0x20] sm:$0xff]  ;;  %s498_s15 = smov 32  }
   0x9   :  { %v102_v34 = vand.u32 4294901760, %v574_v21  ;;  %v606_v35 = vand.u32 4294901760, %v19_v26  ;;  %230 = vmatpush.msra.mxu3 %v528_v5  ;;  %v91_v39 = vsub.f32 %v568_v19, %v90_v27  ;;  %v617_v40 = vsub.f32 %v21_v13, %v580_v25  ;;  %v16_v47 = vld [vmem:[%s818_s1 + $0x18] sm:$0xff]  ;;  %v15_v55 = vld [vmem:[%s818_s1 + $0x10] sm:$0xff]  ;;  %v14_v60 = vld [vmem:[%s818_s1 + $0x8] sm:$0xff]  ;;  %s499_s16 = smov [#allocation2]  }
   0xa   :  { %v74_v37 = vand.u32 4294901760, %v73_v30  ;;  %36 = vmatpush.msra.mxu0 %v539_v9  ;;  %v80_v38 = vand.u32 4294901760, %v79_v31  ;;  %179 = vmatpush.msra.mxu2 %v559_v16  ;;  %v108_v41 = vand.u32 4294901760, %v590_v29  ;;  %v86_v43 = vand.u32 4294901760, %v85_v32  ;;  %v13_v1 = vld [vmem:[%s818_s1] sm:$0xff]  ;;  %s497_s1 = smov 64  }
   0xb   :  { %232 = vmatpush.msra.mxu3 %v539_v9  ;;  %v97_v44 = vsub.f32 %v571_v20, %v96_v33  ;;  %v629_v45 = vand.u32 4294901760, %v18_v36  ;;  %v632_v46 = vsub.f32 %v20_v18, %v587_v28  ;;  %v103_v48 = vsub.f32 %v574_v21, %v102_v34  ;;  %v690_v7 = vld [vmem:[%s817_s0] sm:$0x3]  ;;  %s496_s0 = smov 96   ;;  %s438_s17 = sshll.u32 %s499_s16, 4  ;;  %s439_s17 = int_to_ptr.vmem [resolvable:$true] %s438_s17 }
   0xc   :  { %75 = vmatpush.msra.mxu1 %v74_v37  ;;  %38 = vmatpush.msra.mxu0 %v541_v10  ;;  %v92_v49 = vand.u32 4294901760, %v91_v39  ;;  %v114_v50 = vand.u32 4294901760, %v617_v40  ;;  %v644_v51 = vand.u32 4294901760, %v17_v42  ;;  %v647_v52 = vsub.f32 %v19_v26, %v606_v35  ;;  %s440_s20 = sshll.u32 %s819_s2, 4  ;;  %s441_s20 = int_to_ptr.hbm [resolvable:$true] %s440_s20 }
   0xd   :  { %182 = vmatpush.msra.mxu2 %v568_v19  ;;  %234 = vmatpush.msra.mxu3 %v541_v10  ;;  %v109_v53 = vsub.f32 %v590_v29, %v108_v41  ;;  %v652_v54 = vand.u32 4294901760, %v16_v47  ;;  %v98_v56 = vand.u32 4294901760, %v97_v44  ;;  %v120_v57 = vand.u32 4294901760, %v632_v46 }
   0xe   :  { %81 = vmatpush.msra.mxu1 %v80_v38  ;;  %40 = vmatpush.msra.mxu0 %v543_v11  ;;  %v662_v58 = vsub.f32 %v18_v36, %v629_v45  ;;  %v104_v59 = vand.u32 4294901760, %v103_v48  ;;  %v115_v61 = vsub.f32 %v617_v40, %v114_v50  ;;  %v126_v62 = vand.u32 4294901760, %v647_v52 }
   0xf   :  { %185 = vmatpush.msra.mxu2 %v571_v20  ;;  %236 = vmatpush.msra.mxu3 %v543_v11  ;;  %v674_v63 = vand.u32 4294901760, %v15_v55  ;;  %v677_v0 = vsub.f32 %v17_v42, %v644_v51  ;;  %v110_v2 = vand.u32 4294901760, %v109_v53  ;;  %v683_v6 = vsub.f32 %v16_v47, %v652_v54 }
  0x10   :  { %87 = vmatpush.msra.mxu1 %v86_v43  ;;  %42 = vmatpush.msra.mxu0 %v561_v17  ;;  %v121_v8 = vsub.f32 %v632_v46, %v120_v57  ;;  %v132_v12 = vand.u32 4294901760, %v662_v58  ;;  %v697_v13 = vand.u32 4294901760, %v14_v60  ;;  %v700_v18 = vand.u32 4294901760, %v690_v7 }
  0x11   :  { %188 = vmatpush.msra.mxu2 %v574_v21  ;;  %238 = vmatpush.msra.mxu3 %v561_v17  ;;  %v702_v26 = vand.u32 4294901760, %v13_v1  ;;  %v116_v30 = vand.u32 4294901760, %v115_v61  ;;  %v127_v31 = vsub.f32 %v647_v52, %v126_v62  ;;  %v138_v32 = vand.u32 4294901760, %v677_v0 }
  0x12   :  { %93 = vmatpush.msra.mxu1 %v92_v49  ;;  %44 = vmatpush.msra.mxu0 %v580_v25  ;;  %v712_v36 = vsub.f32 %v15_v55, %v674_v63  ;;  %v144_v37 = vand.u32 4294901760, %v683_v6  ;;  %v122_v38 = vand.u32 4294901760, %v121_v8  ;;  %v133_v39 = vsub.f32 %v662_v58, %v132_v12 }
  0x13   :  { %191 = vmatpush.msra.mxu2 %v590_v29  ;;  %240 = vmatpush.msra.mxu3 %v580_v25  ;;  %v722_v42 = vsub.f32 %v14_v60, %v697_v13  ;;  %v62_v43 = vsub.f32 %v690_v7, %v700_v18  ;;  %v128_v44 = vand.u32 4294901760, %v127_v31  ;;  %v139_v47 = vsub.f32 %v677_v0, %v138_v32 }
  0x14   :  { %99 = vmatpush.msra.mxu1 %v98_v56  ;;  %46 = vmatpush.msra.mxu0 %v587_v28  ;;  %v150_v48 = vand.u32 4294901760, %v712_v36  ;;  %v734_v49 = vsub.f32 %v13_v1, %v702_v26  ;;  %v134_v53 = vand.u32 4294901760, %v133_v39  ;;  %v145_v55 = vsub.f32 %v683_v6, %v144_v37 }
  0x15   :  { %194 = vmatpush.msra.mxu2 %v617_v40  ;;  %242 = vmatpush.msra.mxu3 %v587_v28  ;;  %v156_v56 = vand.u32 4294901760, %v722_v42  ;;  %v140_v60 = vand.u32 4294901760, %v139_v47  ;;  %vm370_vm0 = vcmask 25600   ;;  %v492_v21 = vmov 2  }
  0x16   :  { %105 = vmatpush.msra.mxu1 %v104_v59  ;;  %48 = vmatpush.msra.mxu0 %v606_v35  ;;  %v63_v59 = vand.u32 4294901760, %v62_v43  ;;  %v151_v61 = vsub.f32 %v712_v36, %v150_v48  ;;  %v162_v1 = vand.u32 4294901760, %v734_v49  ;;  %vm431_vm5 = vcmask 254976  }
  0x17   :  { %197 = vmatpush.msra.mxu2 %v632_v46  ;;  %244 = vmatpush.msra.mxu3 %v606_v35  ;;  %v157_v8 = vsub.f32 %v722_v42, %v156_v56 }
  0x18   :  { %111 = vmatpush.msra.mxu1 %v110_v2  ;;  %50 = vmatpush.msra.mxu0 %v629_v45  ;;  %v146_v2 = vand.u32 4294901760, %v145_v55  ;;  %v152_v31 = vand.u32 4294901760, %v151_v61 }
  0x19   :  { %200 = vmatpush.msra.mxu2 %v647_v52  ;;  %246 = vmatpush.msra.mxu3 %v629_v45  ;;  %v158_v39 = vand.u32 4294901760, %v157_v8 }
  0x1a   :  { %117 = vmatpush.msra.mxu1 %v116_v30  ;;  %52 = vmatpush.msra.mxu0 %v644_v51  ;;  %v64_v30 = vsub.f32 %v62_v43, %v63_v59 }
  0x1b   :  { %203 = vmatpush.msra.mxu2 %v662_v58  ;;  %248 = vmatpush.msra.mxu3 %v644_v51 }
  0x1c   :  { %123 = vmatpush.msra.mxu1 %v122_v38  ;;  %54 = vmatpush.msra.mxu0 %v652_v54  ;;  %v163_v38 = vsub.f32 %v734_v49, %v162_v1 }
  0x1d   :  { %206 = vmatpush.msra.mxu2 %v677_v0  ;;  %250 = vmatpush.msra.mxu3 %v652_v54 }
  0x1e   :  { %129 = vmatpush.msra.mxu1 %v128_v44  ;;  %56 = vmatpush.msra.mxu0 %v674_v63  ;;  %v65_v44 = vand.u32 4294901760, %v64_v30  ;;  %v164_v47 = vand.u32 4294901760, %v163_v38 }
  0x1f   :  { %209 = vmatpush.msra.mxu2 %v683_v6  ;;  %252 = vmatpush.msra.mxu3 %v674_v63 }
  0x20   :  { %135 = vmatpush.msra.mxu1 %v134_v53  ;;  %58 = vmatpush.msra.mxu0 %v697_v13 }
  0x21   :  { %212 = vmatpush.msra.mxu2 %v712_v36  ;;  %254 = vmatpush.msra.mxu3 %v697_v13 }
  0x22   :  { %141 = vmatpush.msra.mxu1 %v140_v60  ;;  %60 = vmatpush.msra.mxu0 %v702_v26 }
  0x23   :  { %215 = vmatpush.msra.mxu2 %v722_v42  ;;  %256 = vmatpush.msra.mxu3 %v702_v26 }
  0x24   :  { %267 = vmatpush.msrb.mxu0 %v72_v22  ;;  %147 = vmatpush.msra.mxu1 %v146_v2  ;;  %v493_v22 = vmov 1  }
  0x25   :  { %218 = vmatpush.msra.mxu2 %v734_v49  ;;  %260 = vmatmul.f32.vlgmr.msra.gmra.mxu3 %v63_v59 }
  0x26   :  { %271 = vmatpush.msrb.mxu0 %v78_v23  ;;  %153 = vmatpush.msra.mxu1 %v152_v31  ;;  %v494_v23 = vmov 0  }
  0x27   :  { %221 = vmatmul.f32.vlgmr.msra.gmra.mxu2 %v62_v43  ;;  %66 = vmatmul.f32.vlgmr.msra.gmra.mxu0 %v65_v44 }
  0x28   :  { %275 = vmatpush.msrb.mxu0 %v84_v24  ;;  %159 = vmatpush.msra.mxu1 %v158_v39 }
  0x29   :  { %458 = vset.pattern.permute.xlu1 %v492_v21  ;;  %457 = vset.pattern.permute.xlu0 %v493_v22 }
  0x2a   :  { %279 = vmatpush.msrb.mxu0 %v90_v27  ;;  %165 = vmatpush.msra.mxu1 %v164_v47 }
  0x2b   :  { %167 = vmatmul.f32.vlgmr.msra.gmra.mxu1 %v700_v18  ;;  %460 = vset.pattern.permute.xlu2 %v494_v23 }
  0x2c   :  { %334 = vmatpush.msrb.mxu1 %v524_v3  ;;  %283 = vmatpush.msrb.mxu0 %v96_v33  ;;  %v495_v33 = vmov 3  }
  0x2e   :  { %336 = vmatpush.msrb.mxu1 %v526_v4  ;;  %287 = vmatpush.msrb.mxu0 %v102_v34 }
  0x30   :  { %338 = vmatpush.msrb.mxu1 %v528_v5  ;;  %291 = vmatpush.msrb.mxu0 %v108_v41 }
  0x32   :  { %340 = vmatpush.msrb.mxu1 %v539_v9  ;;  %295 = vmatpush.msrb.mxu0 %v114_v50 }
  0x34   :  { %342 = vmatpush.msrb.mxu1 %v541_v10  ;;  %299 = vmatpush.msrb.mxu0 %v120_v57 }
  0x36   :  { %344 = vmatpush.msrb.mxu1 %v543_v11  ;;  %303 = vmatpush.msrb.mxu0 %v126_v62 }
  0x38   :  { %346 = vmatpush.msrb.mxu1 %v561_v17  ;;  %307 = vmatpush.msrb.mxu0 %v132_v12 }
  0x3a   :  { %348 = vmatpush.msrb.mxu1 %v580_v25  ;;  %311 = vmatpush.msrb.mxu0 %v138_v32 }
  0x3c   :  { %350 = vmatpush.msrb.mxu1 %v587_v28  ;;  %315 = vmatpush.msrb.mxu0 %v144_v37 }
  0x3e   :  { %352 = vmatpush.msrb.mxu1 %v606_v35  ;;  %319 = vmatpush.msrb.mxu0 %v150_v48 }
  0x40   :  { %354 = vmatpush.msrb.mxu1 %v629_v45  ;;  %323 = vmatpush.msrb.mxu0 %v156_v56 }
  0x42   :  { %356 = vmatpush.msrb.mxu1 %v644_v51  ;;  %327 = vmatpush.msrb.mxu0 %v162_v1 }
  0x43   :  { %329 = vmatmul.f32.vlgmr.msrb.gmra.mxu0 %v700_v18 }
  0x44   :  { %358 = vmatpush.msrb.mxu1 %v652_v54 }
  0x46   :  { %360 = vmatpush.msrb.mxu1 %v674_v63 }
  0x48   :  { %362 = vmatpush.msrb.mxu1 %v697_v13 }
  0x4a   :  { %364 = vmatpush.msrb.mxu1 %v702_v26 }
  0x4b   :  { %366 = vmatmul.f32.vlgmr.msrb.gmra.mxu1 %v700_v18 }
  0xa4   :  { %v67_v4 = vpop.f32.mrf.mxu0 }
  0xa8   :  { %v168_v3 = vpop.f32.mrf.mxu1  ;;  %v261_v11 = vpop.f32.mrf.mxu3 }
  0xa9   :  { %v169_v5 = vadd.f32 %v168_v3, %v67_v4 }
  0xaa   :  { %v222_v9 = vpop.f32.mrf.mxu2 }
  0xab   :  { %v223_v10 = vadd.f32 %v222_v9, %v169_v5 }
  0xad   :  { %v262_v14 = vadd.f32 %v261_v11, %v223_v10 }
  0xc0   :  { %v330_v15 = vpop.f32.mrf.mxu0 }
  0xc1   :  { %v331_v16 = vadd.f32 %v330_v15, %v262_v14 }
  0xc8   :  { %v367_v17 = vpop.f32.mrf.mxu1 }
  0xc9   :  { %v368_v19 = vadd.f32 %v367_v17, %v331_v16 }
  0xcb   :  { %v371_v20 = vsel %vm370_vm0, %v368_v19, -inf }
  0xcc   :  { %372 = vmax.xlane.f32.xlu0 %v371_v20 }
 0x13f   :  { %v373_v24 = vpop.xlane.xlu0 %372 }
 0x140   :  { %v374_v25 = vsub.f32 %v368_v19, %v373_v24 }
 0x142   :  { %v375_v27 = vmul.f32 1.442695, %v374_v25 }
 0x144   :  { %462 = vpow2.f32 %v375_v27 }
 0x14a   :  { %v463_v28 = vpop.eup %462 }
 0x14b   :  { %411 = vperm.xlu1 %458, %v463_v28   ;;  %401 = vperm.xlu0 %457, %v463_v28   ;;  %v377_v29 = vsel %vm370_vm0, %v463_v28, 0.0 }
 0x14c   :  { %378 = vadd.xlane.f32.xlu2 %v377_v29 }
 0x153   :  { %459 = vset.pattern.permute.xlu1 %v495_v33  ;;  %461 = vset.pattern.permute.xlu0 %v495_v33 }
 0x154   :  { %421 = vperm.xlu1 %459, %v463_v28  }
 0x164   :  { %396 = vperm.xlu2 %460, %v463_v28  }
 0x1bd   :  { %v402_v34 = vpop.permute.xlu0 %401  ;;  %v412_v40 = vpop.permute.xlu1 %411 }
 0x1be   :  { %v404_v35 = vmul.f32 %v402_v34, %v690_v7  ;;  %v414_v41 = vmul.f32 %v412_v40, %v690_v7 }
 0x1bf   :  { %v379_v50 = vpop.xlane.xlu2 %378 }
 0x1c0   :  { %406 = vrot.lane.b32.xlu1 %v404_v35, %s496_s0  ;;  %464 = vrcp.f32 %v379_v50  ;;  %v391_v12 = vand.u32 2147483648, %v379_v50  ;;  %vm385_vm2 = vweird.f32 %v379_v50  ;;  %v389_v18 = vand.u32 2147483647, %v379_v50 }
 0x1c2   :  { %v392_v37 = vor.u32 1.1754944e-38, %v391_v12  ;;  %vm390_vm4 = vcmp.eq.f32.partialorder %v389_v18, 8.507059e+37 }
 0x1c6   :  { %v422_v45 = vpop.permute.xlu1 %421  ;;  %v465_v51 = vpop.eup %464 }
 0x1c7   :  { %v424_v46 = vmul.f32 %v422_v45, %v690_v7  ;;  %v381_v52 = vmul.f32 %v465_v51, %v379_v50  ;;  %v397_v62 = vpop.permute.xlu2 %396  ;;  %vm386_vm1 = vweird.f32 %v465_v51 }
 0x1c8   :  { %416 = vrot.lane.b32.xlu1 %v414_v41, %s497_s1  ;;  %v399_v0 = vmul.f32 %v397_v62, %v690_v7  ;;  %vm387_vm3 = vmor %vm385_vm2, %vm386_vm1 }
 0x1c9   :  { %v382_v57 = vsub.f32 1.0, %v381_v52 }
 0x1cb   :  { %v383_v58 = vmul.f32 %v465_v51, %v382_v57 }
 0x1cd   :  { %v384_v6 = vadd.f32 %v465_v51, %v383_v58 }
 0x1cf   :  { %v388_v32 = vsel %vm387_vm3, %v465_v51, %v384_v6 }
 0x1d0   :  { %426 = vrot.lane.b32.xlu1 %v424_v46, %s498_s15  ;;  %v393_v7 = vsel %vm390_vm4, %v392_v37, %v388_v32 }
 0x232   :  { %v407_v54 = vpop.permute.xlu1 %406 }
 0x233   :  { %v409_v13 = vadd.f32 %v407_v54, %v399_v0 }
 0x23a   :  { %v417_v63 = vpop.permute.xlu1 %416 }
 0x23b   :  { %v419_v26 = vadd.f32 %v417_v63, %v409_v13 }
 0x242   :  { %v427_v36 = vpop.permute.xlu1 %426 }
 0x243   :  { %v429_v42 = vadd.f32 %v427_v36, %v419_v26 }
 0x245   :  { %v430_v43 = vmul.f32 %v429_v42, %v393_v7 }
 0x247   :  { %432 = vst.msk [vmem:[#allocation2] sm:$0x3] %vm431_vm5, %v430_v43 }
 0x248   :  { %443 = dma.vmem_to_hbm [thread:$0]  %s439_s17, 32, %s441_s20, [#allocation3]  }
 0x249   :  { %490 = dma.done.wait [#allocation3], 32  }
 0x24a   :  { %491 = vsyncadd [#allocation3], 4294967264 }
 0x24b   :  { %448 = vsyncpa [#allocation3], 1 }

</bundles_post_ra>
